<compile_context>
chip_gen: v5e
topology: v5e:2x2
jax: 0.10.0
libtpu: 0.0.40
codegen_flags: <defaults>
</compile_context>

<pallas_src>
import math
from functools import partial

import jax
import jax.numpy as jnp
from jax.experimental import pallas as pl
from jax.experimental.pallas import tpu as pltpu

_COL_BITS = 11                               # supports tn up to 2048 local columns
_VAL_BITS = 31 - _COL_BITS                   # 20-bit quantized cosine
_VAL_SCALE = float((1 << _VAL_BITS) - 1) / 2.0
_SENTINEL = int(jnp.iinfo(jnp.int32).min)    # below every valid packed key
_NCP = 128                                   # lane-dense candidate slab per C-tile


def _pick_tile(dim, candidates):
    for c in candidates:
        if dim % c == 0:
            return c
    raise ValueError(f"no tile in {candidates} divides {dim}")


def _arcface_kernel(x_ref, w_ref, y_ref,
                    logits_ref, intra_ref, cand_ref,
                    xn_ref, *, s, m, nc, tn, c_real, c_pad):
    j = pl.program_id(1)

    # Normalize x for this B-tile once (first C-tile) and cache it as bf16.
    @pl.when(j == 0)
    def _():
        x = x_ref[...].astype(jnp.float32)
        ssq = jnp.sum(x * x, axis=-1, keepdims=True)
        xn_ref[...] = (x * jax.lax.rsqrt(jnp.maximum(ssq, 1e-24))).astype(jnp.bfloat16)
        intra_ref[...] = jnp.zeros_like(intra_ref)

    # bf16 MXU matmul with f32 accumulation.
    cosine = jnp.dot(xn_ref[...], w_ref[...], preferred_element_type=jnp.float32)
    cosine = jnp.clip(cosine, -1.0, 1.0)

    tm = cosine.shape[0]
    local_col = jax.lax.broadcasted_iota(jnp.int32, (tm, tn), 1)
    # Target column of this tile (labels are global column ids).
    onehot = local_col == (y_ref[...] - j * tn)

    # Target cosine: nonzero only in the C-tile containing the label column;
    # accumulate into the resident intra output block.
    tcos = jnp.sum(jnp.where(onehot, cosine, 0.0), axis=-1, keepdims=True)
    intra_ref[...] += tcos

    # Additive angular margin (applied only at the target column of its tile).
    # theta < pi - m  <=>  cos(theta) > cos(pi - m);  cos(theta+m) expanded.
    th_mask = tcos > math.cos(math.pi - m)
    sin_t = jnp.sqrt(jnp.maximum(1.0 - tcos * tcos, 0.0))
    margin = jnp.where(th_mask,
                       tcos * math.cos(m) - sin_t * math.sin(m),
                       tcos - math.sin(math.pi - m) * m)
    # Store logits before the candidate phase so the cosine buffer can be reused.
    logits_ref[...] = s * jnp.where(onehot, margin, cosine)

    # ---- per-tile top-nc hard negatives via packed int32 keys -----------------
    # key = quantized_cosine(20b) << 11 | local_col(11b); monotone in cosine.
    q = ((cosine + 1.0) * _VAL_SCALE).astype(jnp.int32)          # in [0, 2^20-1]
    packed = (q << _COL_BITS) | local_col
    packed = jnp.where(onehot, _SENTINEL, packed)                 # exclude target
    if c_pad != c_real:                                           # mask padded cols
        packed = jnp.where(local_col >= (c_real - j * tn), _SENTINEL, packed)

    cand_ref[...] = jnp.full(cand_ref.shape, _SENTINEL, jnp.int32)
    for t in range(nc):
        kmax = jnp.max(packed, axis=-1, keepdims=True)            # one XLU reduce
        cand_ref[:, pl.ds(t, 1)] = kmax                           # narrow store
        if t + 1 < nc:
            packed = jnp.where(packed == kmax, _SENTINEL, packed) # drop selected col


@partial(jax.jit, static_argnames=("nc", "s", "m"))
def arcface_forward(x, weights, y, nc, s=64.0, m=0.5):
    B, D = x.shape
    D2, C = weights.shape
    assert D == D2
    assert 0 < nc <= min(C - 1, _NCP)

    # Column-normalize the weight parameters once per call; bf16 MXU operands.
    w32 = weights.astype(jnp.float32)
    wn = w32 * jax.lax.rsqrt(jnp.maximum(jnp.sum(w32 * w32, axis=0, keepdims=True), 1e-24))
    wn = wn.astype(jnp.bfloat16)

    # Pad B to a multiple of 8 and C to a multiple of 128 (lane-aligned blocks; no
    # full-extent BlockSpec fallback).  Padded rows/cols are masked / sliced off.
    Bp = -(-B // 8) * 8
    Cp = -(-C // 128) * 128
    xp = jnp.pad(x, ((0, Bp - B), (0, 0))) if Bp != B else x
    wp = jnp.pad(wn, ((0, 0), (0, Cp - C))) if Cp != C else wn
    y32 = y.astype(jnp.int32)
    yp = jnp.pad(y32, (0, Bp - B)) if Bp != B else y32
    y2 = yp.reshape(Bp, 1)

    # tm capped at 128 (vreg pressure / v7x megacore); ensure >=2 B-tiles if B>=256.
    tm = _pick_tile(Bp, (256, 128, 64, 32, 16, 8))
    if tm > 128 and Bp // tm < 2:
        tm = _pick_tile(Bp, (128, 64, 32, 16, 8))
    tn = _pick_tile(Cp, (512, 256, 128))     # <=512 keeps v7x's 64 MiB VMEM happy
    assert tn <= (1 << _COL_BITS)
    nbi, ncj = Bp // tm, Cp // tn

    kernel = partial(_arcface_kernel, s=float(s), m=float(m), nc=int(nc),
                     tn=int(tn), c_real=int(C), c_pad=int(Cp))
    logits, intra, cand = pl.pallas_call(
        kernel,
        out_shape=(
            jax.ShapeDtypeStruct((Bp, Cp), jnp.float32),
            jax.ShapeDtypeStruct((Bp, 1), jnp.float32),
            jax.ShapeDtypeStruct((Bp, ncj * _NCP), jnp.int32),
        ),
        grid=(nbi, ncj),
        in_specs=[
            pl.BlockSpec((tm, D), lambda i, j: (i, 0)),
            pl.BlockSpec((D, tn), lambda i, j: (0, j)),
            pl.BlockSpec((tm, 1), lambda i, j: (i, 0)),
        ],
        out_specs=(
            pl.BlockSpec((tm, tn), lambda i, j: (i, j)),
            pl.BlockSpec((tm, 1), lambda i, j: (i, 0)),
            pl.BlockSpec((tm, _NCP), lambda i, j: (i, j)),
        ),
        scratch_shapes=[pltpu.VMEM((tm, D), jnp.bfloat16)],
        compiler_params=pltpu.CompilerParams(
            dimension_semantics=("parallel", "arbitrary"),
            vmem_limit_bytes=40 * 1024 * 1024),
    )(xp, wp, y2)

    logits = logits[:B, :C]
    intra_scores = intra[:B, 0]

    # Merge per-tile candidates: each C-tile contributed its own top-nc, so the
    # global top-nc is guaranteed among them.  The packed key is monotone in the
    # quantized cosine, so top_k over the keys ranks values directly; the global
    # column is (tile base) + (local column from the key's low bits).
    cand = cand[:B]
    base = (jnp.arange(ncj * _NCP, dtype=jnp.int32) // _NCP) * tn
    gcol = base[None, :] + (cand & ((1 << _COL_BITS) - 1))
    _, pos = jax.lax.top_k(cand, nc)
    hard_indexes = jnp.take_along_axis(gcol, pos, axis=-1)
    return logits, intra_scores, hard_indexes


def _reference(x, weights, y, nc, s, m):
    xn = x / jnp.maximum(jnp.linalg.norm(x, axis=-1, keepdims=True), 1e-12)
    wn = weights / jnp.maximum(jnp.linalg.norm(weights, axis=0, keepdims=True), 1e-12)
    cosine = jnp.clip(xn @ wn, -1.0, 1.0)
    B = x.shape[0]
    tcos = cosine[jnp.arange(B), y]
    theta = jnp.arccos(tcos)
    mask = theta < math.pi - m
    margin = jnp.where(mask, jnp.cos(theta + m), tcos - math.sin(math.pi - m) * m)
    logits = s * cosine.at[jnp.arange(B), y].set(margin)
    neg = cosine.at[jnp.arange(B), y].set(-1.0)
    _, hard = jax.lax.top_k(neg, nc)
    return logits, tcos, hard


if __name__ == "__main__":
    key = jax.random.PRNGKey(0)
    B, in_dim, out_dim, nc = 8, 128, 384, 4   # out_dim=384 -> 3 C-tiles of 128
    s, m = 64.0, 0.5

    kx, kw, ky = jax.random.split(key, 3)
    x = jax.random.normal(kx, (B, in_dim), dtype=jnp.float32)
    # nn.init.normal_(self.weights, std=0.01), shape (in_dim, out_dim)
    weights = 0.01 * jax.random.normal(kw, (in_dim, out_dim), dtype=jnp.float32)
    y = jax.random.randint(ky, (B,), 0, out_dim, dtype=jnp.int32)

    logits, intra_scores, hard_indexes = arcface_forward(x, weights, y, nc, s=s, m=m)
    jax.block_until_ready((logits, intra_scores, hard_indexes))

    # dict_indexes is host-side glue in the original module (torch.no_grad block)
    dict_indexes = {int(k): v for k, v in
                    zip(jax.device_get(y), jax.device_get(hard_indexes))}

    # Light correctness check vs. a pure-f32 JAX reference (bf16 MXU operands
    # -> loose tolerance at the cosine scale).
    ref_logits, ref_intra, _ = _reference(x, weights, y, nc, s, m)
    assert logits.shape == (B, out_dim)
    assert intra_scores.shape == (B,)
    assert hard_indexes.shape == (B, nc)
    assert float(jnp.max(jnp.abs(logits - ref_logits))) / s < 3e-2
    assert float(jnp.max(jnp.abs(intra_scores - ref_intra))) < 3e-2
    assert bool(jnp.all(hard_indexes != y[:, None]))
    print("KERNEL_OK")
</pallas_src>

<mosaic_0001>
module attributes {stable_mosaic.version = 11 : i64} {
  func.func @_arcface_kernel(%arg0: i32, %arg1: i32, %arg2: memref<8x128xf32, #tpu.memory_space<vmem>>, %arg3: memref<128x128xbf16, #tpu.memory_space<vmem>>, %arg4: memref<8x1xi32, #tpu.memory_space<vmem>>, %arg5: memref<8x128xf32, #tpu.memory_space<vmem>>, %arg6: memref<8x1xf32, #tpu.memory_space<vmem>>, %arg7: memref<8x128xi32, #tpu.memory_space<vmem>>, %arg8: memref<8x128xbf16, #tpu.memory_space<vmem>>) attributes {dimension_semantics = [#tpu.dimension_semantics<parallel>, #tpu.dimension_semantics<arbitrary>], iteration_bounds = array<i64: 1, 3>, scalar_prefetch = 0 : i64, scratch_operands = 1 : i64, tpu.core_type = #tpu.core_type<tc>, window_params = [{transform_indices = @transform_0, window_bounds = array<i64: 8, 128>}, {transform_indices = @transform_1, window_bounds = array<i64: 128, 128>}, {transform_indices = @transform_2, window_bounds = array<i64: 8, 1>}, {transform_indices = @transform_3, window_bounds = array<i64: 8, 128>}, {transform_indices = @transform_4, window_bounds = array<i64: 8, 1>}, {transform_indices = @transform_5, window_bounds = array<i64: 8, 128>}]} {
    %c0_i32 = arith.constant 0 : i32
    %0 = arith.cmpi eq, %arg1, %c0_i32 : i32
    %1 = arith.extui %0 : i1 to i32
    %c0_i32_0 = arith.constant 0 : i32
    %2 = arith.cmpi ne, %1, %c0_i32_0 : i32
    scf.if %2 {
      %c0_40 = arith.constant 0 : index
      %c0_41 = arith.constant 0 : index
      %82 = vector.load %arg2[%c0_40, %c0_41] : memref<8x128xf32, #tpu.memory_space<vmem>>, vector<8x128xf32>
      %83 = arith.mulf %82, %82 : vector<8x128xf32>
      %cst_42 = arith.constant dense<0.000000e+00> : vector<8xf32>
      %84 = vector.multi_reduction <add>, %83, %cst_42 [1] : vector<8x128xf32> to vector<8xf32>
      %85 = vector.shape_cast %84 : vector<8xf32> to vector<8x1xf32>
      %cst_43 = arith.constant 1.000000e-24 : f32
      %86 = vector.broadcast %cst_43 : f32 to vector<8x1xf32>
      %87 = arith.maximumf %85, %86 : vector<8x1xf32>
      %88 = math.rsqrt %87 : vector<8x1xf32>
      %89 = vector.broadcast %88 : vector<8x1xf32> to vector<8x128xf32>
      %90 = arith.mulf %82, %89 : vector<8x128xf32>
      %91 = arith.truncf %90 : vector<8x128xf32> to vector<8x128xbf16>
      %c0_44 = arith.constant 0 : index
      %c0_45 = arith.constant 0 : index
      %92 = vector.load %arg8[%c0_44, %c0_45] : memref<8x128xbf16, #tpu.memory_space<vmem>>, vector<8x128xbf16>
      tpu.vector_store %arg8[%c0_44, %c0_45], %91 {strides = array<i32>} : memref<8x128xbf16, #tpu.memory_space<vmem>>, vector<8x128xbf16>,
      %cst_46 = arith.constant 0.000000e+00 : f32
      %93 = vector.broadcast %cst_46 : f32 to vector<8x1xf32>
      %c0_47 = arith.constant 0 : index
      %c0_48 = arith.constant 0 : index
      %94 = vector.load %arg6[%c0_47, %c0_48] : memref<8x1xf32, #tpu.memory_space<vmem>>, vector<8x1xf32>
      tpu.vector_store %arg6[%c0_47, %c0_48], %93 {strides = array<i32>} : memref<8x1xf32, #tpu.memory_space<vmem>>, vector<8x1xf32>,
    } else {
    }
    %c0 = arith.constant 0 : index
    %c0_1 = arith.constant 0 : index
    %3 = vector.load %arg8[%c0, %c0_1] : memref<8x128xbf16, #tpu.memory_space<vmem>>, vector<8x128xbf16>
    %c0_2 = arith.constant 0 : index
    %c0_3 = arith.constant 0 : index
    %4 = vector.load %arg3[%c0_2, %c0_3] : memref<128x128xbf16, #tpu.memory_space<vmem>>, vector<128x128xbf16>
    %cst = arith.constant dense<0.000000e+00> : vector<8x128xf32>
    %5 = tpu.matmul %3, %4, %cst {dimension_numbers = #tpu.dot_dimension_numbers<[1], [0], [0], [1], [0, 0, 1, 1], [], []>} : vector<8x128xbf16>, vector<128x128xbf16>, vector<8x128xf32> -> vector<8x128xf32>
    %cst_4 = arith.constant -1.000000e+00 : f32
    %cst_5 = arith.constant 1.000000e+00 : f32
    %6 = vector.broadcast %cst_4 : f32 to vector<8x128xf32>
    %7 = arith.maximumf %6, %5 : vector<8x128xf32>
    %8 = vector.broadcast %cst_5 : f32 to vector<8x128xf32>
    %9 = arith.minimumf %8, %7 : vector<8x128xf32>
    %10 = tpu.iota {dimensions = array<i32: 1>} : vector<8x128xi32>
    %c0_6 = arith.constant 0 : index
    %c0_7 = arith.constant 0 : index
    %11 = vector.load %arg4[%c0_6, %c0_7] : memref<8x1xi32, #tpu.memory_space<vmem>>, vector<8x1xi32>
    %c128_i32 = arith.constant 128 : i32
    %12 = arith.muli %arg1, %c128_i32 : i32
    %13 = vector.broadcast %12 : i32 to vector<8x1xi32>
    %14 = arith.subi %11, %13 : vector<8x1xi32>
    %15 = vector.broadcast %14 : vector<8x1xi32> to vector<8x128xi32>
    %16 = arith.cmpi eq, %10, %15 : vector<8x128xi32>
    %cst_8 = arith.constant 0.000000e+00 : f32
    %17 = vector.broadcast %cst_8 : f32 to vector<8x128xf32>
    %18 = arith.select %16, %9, %17 : vector<8x128xi1>, vector<8x128xf32>
    %cst_9 = arith.constant dense<0.000000e+00> : vector<8xf32>
    %19 = vector.multi_reduction <add>, %18, %cst_9 [1] : vector<8x128xf32> to vector<8xf32>
    %20 = vector.shape_cast %19 : vector<8xf32> to vector<8x1xf32>
    %c0_10 = arith.constant 0 : index
    %c0_11 = arith.constant 0 : index
    %21 = vector.load %arg6[%c0_10, %c0_11] : memref<8x1xf32, #tpu.memory_space<vmem>>, vector<8x1xf32>
    %22 = arith.addf %21, %20 : vector<8x1xf32>
    %c0_12 = arith.constant 0 : index
    %c0_13 = arith.constant 0 : index
    %23 = vector.load %arg6[%c0_12, %c0_13] : memref<8x1xf32, #tpu.memory_space<vmem>>, vector<8x1xf32>
    tpu.vector_store %arg6[%c0_12, %c0_13], %22 {strides = array<i32>} : memref<8x1xf32, #tpu.memory_space<vmem>>, vector<8x1xf32>,
    %cst_14 = arith.constant -0.87758255 : f32
    %24 = vector.broadcast %cst_14 : f32 to vector<8x1xf32>
    %25 = arith.cmpf ogt, %20, %24 : vector<8x1xf32>
    %26 = arith.mulf %20, %20 : vector<8x1xf32>
    %cst_15 = arith.constant 1.000000e+00 : f32
    %27 = vector.broadcast %cst_15 : f32 to vector<8x1xf32>
    %28 = arith.subf %27, %26 : vector<8x1xf32>
    %cst_16 = arith.constant 0.000000e+00 : f32
    %29 = vector.broadcast %cst_16 : f32 to vector<8x1xf32>
    %30 = arith.maximumf %28, %29 : vector<8x1xf32>
    %31 = math.sqrt %30 : vector<8x1xf32>
    %cst_17 = arith.constant 0.87758255 : f32
    %32 = vector.broadcast %cst_17 : f32 to vector<8x1xf32>
    %33 = arith.mulf %20, %32 : vector<8x1xf32>
    %cst_18 = arith.constant 0.47942555 : f32
    %34 = vector.broadcast %cst_18 : f32 to vector<8x1xf32>
    %35 = arith.mulf %31, %34 : vector<8x1xf32>
    %36 = arith.subf %33, %35 : vector<8x1xf32>
    %cst_19 = arith.constant 0.239712775 : f32
    %37 = vector.broadcast %cst_19 : f32 to vector<8x1xf32>
    %38 = arith.subf %20, %37 : vector<8x1xf32>
    %39 = arith.select %25, %36, %38 : vector<8x1xi1>, vector<8x1xf32>
    %40 = vector.shape_cast %39 : vector<8x1xf32> to vector<8x1xf32>
    %41 = vector.broadcast %40 : vector<8x1xf32> to vector<8x128xf32>
    %42 = arith.select %16, %41, %9 : vector<8x128xi1>, vector<8x128xf32>
    %cst_20 = arith.constant 6.400000e+01 : f32
    %43 = vector.broadcast %cst_20 : f32 to vector<8x128xf32>
    %44 = arith.mulf %43, %42 : vector<8x128xf32>
    %c0_21 = arith.constant 0 : index
    %c0_22 = arith.constant 0 : index
    %45 = vector.load %arg5[%c0_21, %c0_22] : memref<8x128xf32, #tpu.memory_space<vmem>>, vector<8x128xf32>
    tpu.vector_store %arg5[%c0_21, %c0_22], %44 {strides = array<i32>} : memref<8x128xf32, #tpu.memory_space<vmem>>, vector<8x128xf32>,
    %cst_23 = arith.constant 1.000000e+00 : f32
    %46 = vector.broadcast %cst_23 : f32 to vector<8x128xf32>
    %47 = arith.addf %9, %46 : vector<8x128xf32>
    %cst_24 = arith.constant 524287.5 : f32
    %48 = vector.broadcast %cst_24 : f32 to vector<8x128xf32>
    %49 = arith.mulf %47, %48 : vector<8x128xf32>
    %50 = arith.fptosi %49 : vector<8x128xf32> to vector<8x128xi32>
    %c11_i32 = arith.constant 11 : i32
    %51 = vector.broadcast %c11_i32 : i32 to vector<8x128xi32>
    %52 = arith.shli %50, %51 : vector<8x128xi32>
    %53 = arith.ori %52, %10 : vector<8x128xi32>
    %c-2147483648_i32 = arith.constant -2147483648 : i32
    %54 = vector.broadcast %c-2147483648_i32 : i32 to vector<8x128xi32>
    %55 = arith.select %16, %54, %53 : vector<8x128xi1>, vector<8x128xi32>
    %c-2147483648_i32_25 = arith.constant -2147483648 : i32
    %56 = vector.broadcast %c-2147483648_i32_25 : i32 to vector<8x128xi32>
    %c0_26 = arith.constant 0 : index
    %c0_27 = arith.constant 0 : index
    %57 = vector.load %arg7[%c0_26, %c0_27] : memref<8x128xi32, #tpu.memory_space<vmem>>, vector<8x128xi32>
    tpu.vector_store %arg7[%c0_26, %c0_27], %56 {strides = array<i32>} : memref<8x128xi32, #tpu.memory_space<vmem>>, vector<8x128xi32>,
    %cst_28 = arith.constant dense<-2147483648> : vector<8xi32>
    %58 = vector.multi_reduction <maxsi>, %55, %cst_28 [1] : vector<8x128xi32> to vector<8xi32>
    %59 = vector.shape_cast %58 : vector<8xi32> to vector<8x1xi32>
    %c0_29 = arith.constant 0 : index
    %c0_30 = arith.constant 0 : index
    %60 = vector.load %arg7[%c0_29, %c0_30] : memref<8x128xi32, #tpu.memory_space<vmem>>, vector<8x1xi32>
    tpu.vector_store %arg7[%c0_29, %c0_30], %59 {strides = array<i32>} : memref<8x128xi32, #tpu.memory_space<vmem>>, vector<8x1xi32>,
    %61 = vector.broadcast %59 : vector<8x1xi32> to vector<8x128xi32>
    %62 = arith.cmpi eq, %55, %61 : vector<8x128xi32>
    %c-2147483648_i32_31 = arith.constant -2147483648 : i32
    %63 = vector.broadcast %c-2147483648_i32_31 : i32 to vector<8x128xi32>
    %64 = arith.select %62, %63, %55 : vector<8x128xi1>, vector<8x128xi32>
    %cst_32 = arith.constant dense<-2147483648> : vector<8xi32>
    %65 = vector.multi_reduction <maxsi>, %64, %cst_32 [1] : vector<8x128xi32> to vector<8xi32>
    %66 = vector.shape_cast %65 : vector<8xi32> to vector<8x1xi32>
    %c0_33 = arith.constant 0 : index
    %c1 = arith.constant 1 : index
    %67 = vector.load %arg7[%c0_33, %c1] : memref<8x128xi32, #tpu.memory_space<vmem>>, vector<8x1xi32>
    tpu.vector_store %arg7[%c0_33, %c1], %66 {strides = array<i32>} : memref<8x128xi32, #tpu.memory_space<vmem>>, vector<8x1xi32>,
    %68 = vector.broadcast %66 : vector<8x1xi32> to vector<8x128xi32>
    %69 = arith.cmpi eq, %64, %68 : vector<8x128xi32>
    %c-2147483648_i32_34 = arith.constant -2147483648 : i32
    %70 = vector.broadcast %c-2147483648_i32_34 : i32 to vector<8x128xi32>
    %71 = arith.select %69, %70, %64 : vector<8x128xi1>, vector<8x128xi32>
    %cst_35 = arith.constant dense<-2147483648> : vector<8xi32>
    %72 = vector.multi_reduction <maxsi>, %71, %cst_35 [1] : vector<8x128xi32> to vector<8xi32>
    %73 = vector.shape_cast %72 : vector<8xi32> to vector<8x1xi32>
    %c0_36 = arith.constant 0 : index
    %c2 = arith.constant 2 : index
    %74 = vector.load %arg7[%c0_36, %c2] : memref<8x128xi32, #tpu.memory_space<vmem>>, vector<8x1xi32>
    tpu.vector_store %arg7[%c0_36, %c2], %73 {strides = array<i32>} : memref<8x128xi32, #tpu.memory_space<vmem>>, vector<8x1xi32>,
    %75 = vector.broadcast %73 : vector<8x1xi32> to vector<8x128xi32>
    %76 = arith.cmpi eq, %71, %75 : vector<8x128xi32>
    %c-2147483648_i32_37 = arith.constant -2147483648 : i32
    %77 = vector.broadcast %c-2147483648_i32_37 : i32 to vector<8x128xi32>
    %78 = arith.select %76, %77, %71 : vector<8x128xi1>, vector<8x128xi32>
    %cst_38 = arith.constant dense<-2147483648> : vector<8xi32>
    %79 = vector.multi_reduction <maxsi>, %78, %cst_38 [1] : vector<8x128xi32> to vector<8xi32>
    %80 = vector.shape_cast %79 : vector<8xi32> to vector<8x1xi32>
    %c0_39 = arith.constant 0 : index
    %c3 = arith.constant 3 : index
    %81 = vector.load %arg7[%c0_39, %c3] : memref<8x128xi32, #tpu.memory_space<vmem>>, vector<8x1xi32>
    tpu.vector_store %arg7[%c0_39, %c3], %80 {strides = array<i32>} : memref<8x128xi32, #tpu.memory_space<vmem>>, vector<8x1xi32>,
    return
  }
  func.func @transform_0(%arg0: i32, %arg1: i32) -> (i32, i32) {
    %c0_i32 = arith.constant 0 : i32
    %c0_i32_0 = arith.constant 0 : i32
    return %arg0, %c0_i32 : i32, i32
  }
  func.func @transform_1(%arg0: i32, %arg1: i32) -> (i32, i32) {
    %c0_i32 = arith.constant 0 : i32
    %c0_i32_0 = arith.constant 0 : i32
    return %c0_i32, %arg1 : i32, i32
  }
  func.func @transform_2(%arg0: i32, %arg1: i32) -> (i32, i32) {
    %c0_i32 = arith.constant 0 : i32
    %c0_i32_0 = arith.constant 0 : i32
    return %arg0, %c0_i32 : i32, i32
  }
  func.func @transform_3(%arg0: i32, %arg1: i32) -> (i32, i32) {
    %c0_i32 = arith.constant 0 : i32
    return %arg0, %arg1 : i32, i32
  }
  func.func @transform_4(%arg0: i32, %arg1: i32) -> (i32, i32) {
    %c0_i32 = arith.constant 0 : i32
    %c0_i32_0 = arith.constant 0 : i32
    return %arg0, %c0_i32 : i32, i32
  }
  func.func @transform_5(%arg0: i32, %arg1: i32) -> (i32, i32) {
    %c0_i32 = arith.constant 0 : i32
    return %arg0, %arg1 : i32, i32
  }
}

</mosaic_0001>

<bundles_post_ra>
// kernel: arcface_forward.1
= control target key start
LH: loop header
LB: loop body
LE: loop exit
PB: predicated region body
PF: predicated region fallthrough
CT: control target
= control target key end

     0   :  { %11 = vsyncpa [#allocation5], 0  ;;  %s1254_s0 = inlined_call_operand.vmem [shape: f32[8,128], index: 0, kind: input, shape index: {}]   ;;  %s1255_s1 = inlined_call_operand.vmem [shape: bf16[128,384], index: 1, kind: input, shape index: {}]   ;;  %s1256_s2 = inlined_call_operand.vmem [shape: s32[8,1], index: 2, kind: input, shape index: {}]   ;;  %s1257_s3 = inlined_call_operand.hbm [shape: f32[8,384], index: 3, kind: output, shape index: {0}]   ;;  %s1258_s4 = inlined_call_operand.vmem [shape: f32[8,1], index: 4, kind: output, shape index: {1}]   ;;  %s1259_s5 = inlined_call_operand.vmem [shape: s32[8,384], index: 5, kind: output, shape index: {2}]  }
   0x1   :  { %13 = vsyncpa [#allocation5 + $0x1], 0  ;;  %s1066_s18 = smov 0   ;;  %s1068_s19 = smov 0  }
   0x2   :  { %s1070_s20 = smov 0   ;;  %s1072_s21 = smov 0  }
   0x3   :  { %s1074_s22 = smov 0   ;;  %s1076_s23 = smov 0  }
   0x4 LB: > { %s824_s24 = sadd.s32 4294967295, %s1031_s23   ;;  %s825_s25 = sadd.s32 4294967294, %s1031_s23   ;;  %s1031_s23 = sphi %s1076_s23, %s19_s23   ;;  %s1027_s22 = sphi %s1074_s22, %s1266_s22   ;;  %s1023_s21 = sphi %s1072_s21, %s1265_s21   ;;  %s1019_s20 = sphi %s1070_s20, %s1264_s20   ;;  %s1015_s19 = sphi %s1068_s19, %s1263_s19   ;;  %s1011_s18 = sphi %s1066_s18, %s1262_s18  }
   0x5   : > { %s28_s26 = sadd.s32 1, %s1027_s22  ;;  %s64_s27 = sadd.s32 1, %s1019_s20 }
   0x6   : > { %p29_p0 = scmp.ge.s32.totalorder %s28_s26, 3  ;;  %p71_p1 = scmp.ne.s32.totalorder %s1019_s20, %s1015_s19 }
   0x7   : > { %p72_p2 = scmp.eq.s32.totalorder %s1031_s23, 0  ;;  %p129_p3 = scmp.eq.s32.totalorder %s824_s24, 2 }
   0x8   : > { %s1268_s26 = smov (%p29_p0, %s28_s26), 0  ;;  %p134_p6 = scmp.ne.s32.totalorder %s1015_s19, %s1011_s18 }
   0x9   : > { %p73_p4 = por %p72_p2, %p71_p1  ;;  %p1105_p5 = por %p129_p3, %p71_p1 }
   0xa   : > { %s61_s29 = ssub.s32 %s1027_s22, %s1268_s26  ;;  %p135_p8 = scmp.eq.s32.totalorder %s825_s25, 2 }
   0xb   : > { %p62_p7 = scmp.eq.s32.totalorder %s61_s29, 0  ;;  %p829_p10 = scmp.ge.s32.totalorder %s1031_s23, 3 }
   0xc   : > { %p1116_p9 = por %p135_p8, %p134_p6 }
   0xd   : > { %s1114_s30 = scalar_select %p62_p7, %s1019_s20, %s64_s27  }
   0xe   : > { %219 = sbr.rel (%p829_p10) target bundleno = 39 (0x27), region = 24 }
  0x13   : > { %222 = sbr.rel (!%p73_p4) target bundleno = 39 (0x27), region = 28  ;;  %s224_s7 = sand.u32 (%p73_p4), 1, %s1019_s20  }
  0x14   : > { %s831_s8 = sshll.u32 (%p73_p4), %s1027_s22, 2  ;;  %s830_s9 = sshll.u32 (%p73_p4), %s224_s7, 6 }
  0x15   : > { %s1126_s12 = scalar_lea.vmem (%p73_p4), %s1255_s1, %s831_s8  ;;  %s226_s13 = scalar_lea.vmem (%p73_p4), [#allocation3], %s830_s9 }
  0x16   : > { %v245_v0 = vld [vmem:[%s1126_s12] sm:$0xf] (%p73_p4)  ;;  %v247_v1 = vld [vmem:[%s1126_s12 + $0xc] sm:$0xf] (%p73_p4)  ;;  %v249_v2 = vld [vmem:[%s1126_s12 + $0x18] sm:$0xf] (%p73_p4) }
  0x17   : > { %246 = vst [vmem:[%s226_s13] sm:$0xf] (%p73_p4), %v245_v0  ;;  %v251_v3 = vld [vmem:[%s1126_s12 + $0x24] sm:$0xf] (%p73_p4)  ;;  %v253_v4 = vld [vmem:[%s1126_s12 + $0x30] sm:$0xf] (%p73_p4) }
  0x18   : > { %248 = vst [vmem:[%s226_s13 + $0x4] sm:$0xf] %v247_v1  ;;  %v255_v5 = vld [vmem:[%s1126_s12 + $0x3c] sm:$0xf]  ;;  %v257_v6 = vld [vmem:[%s1126_s12 + $0x48] sm:$0xf] }
  0x19   : > { %250 = vst [vmem:[%s226_s13 + $0x8] sm:$0xf] %v249_v2  ;;  %v259_v7 = vld [vmem:[%s1126_s12 + $0x54] sm:$0xf]  ;;  %v261_v8 = vld [vmem:[%s1126_s12 + $0x60] sm:$0xf] }
  0x1a   : > { %252 = vst [vmem:[%s226_s13 + $0xc] sm:$0xf] %v251_v3  ;;  %v263_v9 = vld [vmem:[%s1126_s12 + $0x6c] sm:$0xf]  ;;  %v265_v10 = vld [vmem:[%s1126_s12 + $0x78] sm:$0xf] }
  0x1b   : > { %254 = vst [vmem:[%s226_s13 + $0x10] sm:$0xf] %v253_v4  ;;  %v267_v11 = vld [vmem:[%s1126_s12 + $0x84] sm:$0xf]  ;;  %v269_v12 = vld [vmem:[%s1126_s12 + $0x90] sm:$0xf] }
  0x1c   : > { %256 = vst [vmem:[%s226_s13 + $0x14] sm:$0xf] %v255_v5  ;;  %v271_v13 = vld [vmem:[%s1126_s12 + $0x9c] sm:$0xf]  ;;  %v273_v14 = vld [vmem:[%s1126_s12 + $0xa8] sm:$0xf] }
  0x1d   : > { %258 = vst [vmem:[%s226_s13 + $0x18] sm:$0xf] %v257_v6  ;;  %v275_v15 = vld [vmem:[%s1126_s12 + $0xb4] sm:$0xf] }
  0x1e   : > { %260 = vst [vmem:[%s226_s13 + $0x1c] sm:$0xf] %v259_v7 }
  0x1f   : > { %262 = vst [vmem:[%s226_s13 + $0x20] sm:$0xf] %v261_v8 }
  0x20   : > { %264 = vst [vmem:[%s226_s13 + $0x24] sm:$0xf] %v263_v9 }
  0x21   : > { %266 = vst [vmem:[%s226_s13 + $0x28] sm:$0xf] %v265_v10 }
  0x22   : > { %268 = vst [vmem:[%s226_s13 + $0x2c] sm:$0xf] %v267_v11 }
  0x23   : > { %270 = vst [vmem:[%s226_s13 + $0x30] sm:$0xf] %v269_v12 }
  0x24   : > { %272 = vst [vmem:[%s226_s13 + $0x34] sm:$0xf] %v271_v13 }
  0x25   : > { %274 = vst [vmem:[%s226_s13 + $0x38] sm:$0xf] %v273_v14 }
  0x26   : > { %276 = vst [vmem:[%s226_s13 + $0x3c] sm:$0xf] %v275_v15 }
  0x27 PF: > { %p832_p11 = scmp.ge.s32.totalorder %s1031_s23, 1  ;;  %p331_p12 = scmp.lt.s32.totalorder %s1031_s23, 4 }
  0x29   : > { %p332_p13 = pnand %p832_p11, %p331_p12 }
  0x2a   : > { %s1147_s14 = sand.u32 (!%p332_p13), 1, %s1015_s19   ;;  %p399_p0 = scmp.lt.s32.totalorder (!%p332_p13), %s1023_s21, 2 }
  0x2b   : > { %335 = sbr.rel (%p332_p13) target bundleno = 1347 (0x543), region = 69  ;;  %s833_s15 = sshll.u32 (!%p332_p13), %s1147_s14, 6 }
  0x2c   : > { %s834_s16 = sshll.u32 (!%p332_p13), %s1147_s14, 3  ;;  %s1158_s7 = scalar_lea.vmem (!%p332_p13), [#allocation3], %s833_s15 }
  0x2d   : > { %s1160_s8 = scalar_lea.vmem (!%p332_p13), [#allocation4], %s834_s16  ;;  %p836_p1 = scmp.ne.s32.totalorder (!%p332_p13), %s1023_s21, 0 }
  0x30   : > { %s400_s17 = scalar_select %p399_p0, %s1023_s21, 2 }
  0x31   : > { %408 = sbr.rel (%p836_p1) target bundleno = 198 (0xc6), region = 77 }
  0x32   : > { %s835_s24 = sshll.u32 %s400_s17, 3 }
  0x33   : > { %s1156_s29 = scalar_lea.vmem %s1259_s5, %s835_s24 }
  0x36   : > { %v409_v16 = vld [vmem:[%s1254_s0] sm:$0xff]  ;;  %vm427_vm0 = vcmask 7168   ;;  %v1033_v18 = vmov 0.0  }
  0x37   : > { %v410_v17 = vmul.f32 %v409_v16, %v409_v16  ;;  %428 = vst.msk [vmem:[%s1258_s4] sm:$0xff] %vm427_vm0, %v1033_v18 }
  0x39   : > { %411 = vadd.xlane.f32.xlu0 %v410_v17 }
  0xac   : > { %v412_v19 = vpop.xlane.xlu0 %411 }
  0xad   : > { %v413_v20 = vmax.f32 %v412_v19, 1e-24 }
  0xaf   : > { %948 = vrsqrt.f32 %v413_v20  ;;  %vm420_vm2 = vweird.f32 %v413_v20 }
  0xb5   : > { %v949_v21 = vpop.eup %948 }
  0xb6   : > { %v415_v22 = vmul.f32 %v949_v21, %v413_v20  ;;  %vm421_vm1 = vweird.f32 %v949_v21 }
  0xb7   : > { %vm422_vm3 = vmor %vm420_vm2, %vm421_vm1 }
  0xb8   : > { %v416_v23 = vmul.f32 %v949_v21, %v415_v22 }
  0xba   : > { %v417_v24 = vmul.f32 0.5, %v416_v23 }
  0xbc   : > { %v418_v25 = vsub.f32 1.5, %v417_v24 }
  0xbe   : > { %v419_v26 = vmul.f32 %v949_v21, %v418_v25 }
  0xc0   : > { %v423_v27 = vsel %vm422_vm3, %v949_v21, %v419_v26 }
  0xc1   : > { %v424_v28 = vmul.f32 %v423_v27, %v409_v16 }
  0xc3   : > { %v425_v29 = vpack.c.bf16 %v424_v28, %v424_v28 }
  0xc5   : > { %426 = vst [vmem:[#allocation2] sm:$0xf] %v425_v29 }
  0xc6 PF: > { %v884_v30 = vld [vmem:[%s1158_s7 + $0x38] sm:$0xff]  ;;  %s870_s13 = sshll.u32 %s1023_s21, 7  ;;  %v883_v32 = vld [vmem:[%s1158_s7 + $0x30] sm:$0xff]  ;;  %v1034_v33 = vmov 0   ;;  %v882_v36 = vld [vmem:[%s1158_s7 + $0x28] sm:$0xff]  ;;  %v509_v49 = vlaneseq  ;;  %v1035_v60 = vmov 2147483648  }
  0xc7   : > { %v513_v31 = vstv %s870_s13  ;;  %494 = vmatpush.bf16.msra.mxu0 %v884_v30  ;;  %950 = vset.pattern.permute.xlu0 %v1034_v33  ;;  %v511_v34 = vld [vmem:[%s1256_s2] sm:$0xff]  ;;  %v879_v39 = vld [vmem:[%s1158_s7 + $0x10] sm:$0xff]  ;;  %v878_v40 = vld [vmem:[%s1158_s7 + $0x8] sm:$0xff]  ;;  %vm524_vm7 = vcmask 7168   ;;  %vm588_vm10 = vcmask 15368   ;;  %vm606_vm13 = vcmask 23568  }
  0xc8   : > { %v514_v35 = vsub.s32 %v511_v34, %v513_v31  ;;  %v881_v37 = vld [vmem:[%s1158_s7 + $0x20] sm:$0xff]  ;;  %v880_v38 = vld [vmem:[%s1158_s7 + $0x18] sm:$0xff]  ;;  %v1184_v53 = vand.u32 127, %v509_v49  ;;  %556 = vst [vmem:[%s1156_s29] sm:$0xff] %v1035_v60  ;;  %s653_s12 = sshll.u32 %s1160_s8, 4  ;;  %s627_s15 = scalar_lea.sflag [#allocation5], %s1147_s14  ;;  %s654_s12 = int_to_ptr.vmem [resolvable:$true] %s653_s12 }
  0xc9   : > { %v877_v41 = vld [vmem:[%s1158_s7] sm:$0xff]  ;;  %s873_s7 = sshll.u32 %s1023_s21, 3  ;;  %s973_s21 = scalar_lea.hbm %s1257_s3, 24 }
  0xca   : > { %516 = vperm.xlu0 %950, %v514_v35   ;;  %v522_v31 = vld [vmem:[%s1258_s4] sm:$0xff]  ;;  %s651_s11 = scalar_lea.hbm %s1257_s3, %s873_s7 }
  0xcb   : > { %495 = vmatpush.bf16.msra.mxu0 %v883_v32  ;;  %s655_s13 = sshll.u32 %s651_s11, 4  ;;  %s656_s13 = int_to_ptr.hbm [resolvable:$true] %s655_s13 }
  0xcc   : > { %v429_v42 = vld [vmem:[#allocation2] sm:$0xf]  ;;  %s967_s16 = sshra.s32 %s656_s13, 4  ;;  %s968_s16 = int_to_ptr.hbm [resolvable:$true] %s967_s16 }
  0xcd   : > { %s969_s17 = scalar_lea.hbm %s968_s16, 8  ;;  %p974_p6 = scmp.lt.s32.totalorder %s968_s16, %s1257_s3 }
  0xce   : > { %p970_p2 = scmp.ne.s32.totalorder %s968_s16, %s969_s17  ;;  %p975_p7 = scmp.lt.s32.totalorder %s973_s21, %s969_s17 }
  0xcf   : > { %496 = vmatpush.bf16.msra.mxu0 %v882_v36 }
  0xd0   : > { %p971_p3 = pnand %p970_p2, %p1105_p5  ;;  %p976_p8 = por %p975_p7, %p974_p6 }
  0xd2   : > { %p972_p4 = pneg %p971_p3 }
  0xd3   : > { %497 = vmatpush.bf16.msra.mxu0 %v881_v37 }
  0xd4   : > { %p977_p10 = pnand %p976_p8, %p972_p4 }
  0xd7   : > { %498 = vmatpush.bf16.msra.mxu0 %v880_v38 }
  0xdb   : > { %499 = vmatpush.bf16.msra.mxu0 %v879_v39 }
  0xdf   : > { %500 = vmatpush.bf16.msra.mxu0 %v878_v40 }
  0xe3   : > { %501 = vmatpush.bf16.msra.mxu0 %v877_v41 }
  0xe6   : > { %502 = vmatmul.bf16.vlgmr.msra.gmra.mxu0 %v429_v42 }
 0x13c   : > { %v1186_v54 = vpop.permute.xlu0 %516 }
 0x13d   : > { %vm518_vm5 = vcmp.eq.s32.totalorder %v1184_v53, %v1186_v54 }
 0x163   : > { %v503_v43 = vpop.f32.mrf.mxu0 }
 0x164   : > { %v1181_v44 = vclamps-f32 %v503_v43, 1.0 }
 0x166   : > { %v550_v45 = vadd.f32 1.0, %v1181_v44  ;;  %v519_v25 = vsel %vm518_vm5, %v1181_v44, 0.0 }
 0x168   : > { %v551_v46 = vmul.f32 524287.5, %v550_v45 }
 0x16a   : > { %v886_v47 = vceil.f32 %v551_v46  ;;  %v887_v48 = vfloor.f32 %v551_v46  ;;  %vm885_vm4 = vcmp.lt.s32.totalorder %v551_v46, 0 }
 0x16b   : > { %v505_v50 = vpop.f32.mrf.mxu0 }
 0x16c   : > { %v888_v51 = vsel %vm885_vm4, %v886_v47, %v887_v48 }
 0x16d   : > { %v889_v52 = vcvt.f32.s32 %v888_v51 }
 0x16f   : > { %v553_v55 = vshll.u32 %v889_v52, 11 }
 0x171   : > { %v554_v56 = vor.u32 %v553_v55, %v1184_v53 }
 0x173   : > { %v555_v57 = vsel %vm518_vm5, 2147483648, %v554_v56 }
 0x174   : > { %v558_v58 = vshra.s32 %v555_v57, 16  ;;  %v557_v61 = vand.u32 65535, %v555_v57 }
 0x176   : > { %v560_v59 = vcvt.s32.f32 %v558_v58  ;;  %v559_v63 = vcvt.s32.f32 %v557_v61 }
 0x178   : > { %561 = vmax.xlane.f32.xlu0 %v560_v59 }
 0x1eb   : > { %v562_v62 = vpop.xlane.xlu0 %561 }
 0x1ec   : > { %vm563_vm6 = vcmp.eq.f32.partialorder %v560_v59, %v562_v62  ;;  %v568_v1 = vcvt.f32.s32 %v562_v62 }
 0x1ed   : > { %v564_v0 = vsel %vm563_vm6, %v559_v63, -inf }
 0x1ee   : > { %565 = vmax.xlane.f32.xlu1 %v564_v0  ;;  %v569_v3 = vshll.u32 %v568_v1, 16 }
 0x261   : > { %v566_v2 = vpop.xlane.xlu1 %565 }
 0x262   : > { %v567_v4 = vcvt.f32.s32 %v566_v2 }
 0x264   : > { %v570_v5 = vadd.s32 %v569_v3, %v567_v4 }
 0x266   : > { %571 = vst.msk [vmem:[%s1156_s29] sm:$0xff] %vm524_vm7, %v570_v5  ;;  %vm572_vm8 = vcmp.eq.s32.totalorder %v555_v57, %v570_v5 }
 0x267   : > { %v573_v6 = vsel %vm572_vm8, 2147483648, %v555_v57 }
 0x268   : > { %v575_v7 = vshra.s32 %v573_v6, 16  ;;  %v574_v9 = vand.u32 65535, %v573_v6 }
 0x26a   : > { %v577_v8 = vcvt.s32.f32 %v575_v7  ;;  %v576_v11 = vcvt.s32.f32 %v574_v9 }
 0x26c   : > { %578 = vmax.xlane.f32.xlu1 %v577_v8 }
 0x2df   : > { %v579_v10 = vpop.xlane.xlu1 %578 }
 0x2e0   : > { %vm580_vm9 = vcmp.eq.f32.partialorder %v577_v8, %v579_v10  ;;  %v585_v13 = vcvt.f32.s32 %v579_v10 }
 0x2e1   : > { %v581_v12 = vsel %vm580_vm9, %v576_v11, -inf }
 0x2e2   : > { %582 = vmax.xlane.f32.xlu2 %v581_v12  ;;  %v586_v15 = vshll.u32 %v585_v13, 16 }
 0x355   : > { %v583_v14 = vpop.xlane.xlu2 %582 }
 0x356   : > { %v584_v16 = vcvt.f32.s32 %v583_v14 }
 0x358   : > { %v587_v17 = vadd.s32 %v586_v15, %v584_v16 }
 0x35a   : > { %589 = vst.msk [vmem:[%s1156_s29] sm:$0xff] %vm588_vm10, %v587_v17  ;;  %vm590_vm11 = vcmp.eq.s32.totalorder %v573_v6, %v587_v17 }
 0x35b   : > { %v591_v18 = vsel %vm590_vm11, 2147483648, %v573_v6 }
 0x35c   : > { %v593_v19 = vshra.s32 %v591_v18, 16  ;;  %v592_v21 = vand.u32 65535, %v591_v18 }
 0x35e   : > { %v595_v20 = vcvt.s32.f32 %v593_v19  ;;  %v594_v23 = vcvt.s32.f32 %v592_v21 }
 0x360   : > { %596 = vmax.xlane.f32.xlu2 %v595_v20 }
 0x3d3   : > { %v597_v22 = vpop.xlane.xlu2 %596 }
 0x3d4   : > { %vm598_vm12 = vcmp.eq.f32.partialorder %v595_v20, %v597_v22  ;;  %v603_v26 = vcvt.f32.s32 %v597_v22 }
 0x3d5   : > { %v599_v24 = vsel %vm598_vm12, %v594_v23, -inf }
 0x3d6   : > { %600 = vmax.xlane.f32.xlu1 %v599_v24  ;;  %v604_v28 = vshll.u32 %v603_v26, 16 }
 0x3de   : > { %520 = vadd.xlane.f32.xlu1 %v519_v25 }
 0x449   : > { %v601_v27 = vpop.xlane.xlu1 %600 }
 0x44a   : > { %v602_v29 = vcvt.f32.s32 %v601_v27 }
 0x44c   : > { %v605_v30 = vadd.s32 %v604_v28, %v602_v29 }
 0x44e   : > { %607 = vst.msk [vmem:[%s1156_s29] sm:$0xff] %vm606_vm13, %v605_v30  ;;  %vm608_vm14 = vcmp.eq.s32.totalorder %v591_v18, %v605_v30 }
 0x44f   : > { %v609_v32 = vsel %vm608_vm14, 2147483648, %v591_v18 }
 0x450   : > { %v611_v33 = vshra.s32 %v609_v32, 16  ;;  %v610_v60 = vand.u32 65535, %v609_v32 }
 0x451   : > { %v521_v34 = vpop.xlane.xlu1 %520 }
 0x452   : > { %v523_v35 = vadd.f32 %v522_v31, %v521_v34  ;;  %v527_v36 = vmul.f32 %v521_v34, %v521_v34  ;;  %v613_v37 = vcvt.s32.f32 %v611_v33  ;;  %v542_v51 = vmul.f32 0.87758255, %v521_v34 }
 0x453   : > { %v871_v56 = vadd.f32 -0.23971277, %v521_v34  ;;  %vm526_vm1 = vcmp.gt.f32.partialorder %v521_v34, -0.87758255 }
 0x454   : > { %525 = vst.msk [vmem:[%s1258_s4] sm:$0xff] %vm524_vm7, %v523_v35  ;;  %v528_v38 = vsub.f32 1.0, %v527_v36  ;;  %614 = vmax.xlane.f32.xlu2 %v613_v37 }
 0x456   : > { %v529_v39 = vmax.f32 %v528_v38, 0.0 }
 0x458   : > { %951 = vrsqrt.f32 %v529_v39  ;;  %vm537_vm15 = vcmp.eq.f32.partialorder %v529_v39, inf  ;;  %v540_v48 = vand.u32 2147483648, %v529_v39  ;;  %vm539_vm0 = vcmp.eq.f32.partialorder %v529_v39, 0.0 }
 0x45e   : > { %v952_v40 = vpop.eup %951 }
 0x45f   : > { %v531_v41 = vmul.f32 %v952_v40, %v529_v39 }
 0x461   : > { %v532_v42 = vmul.f32 %v952_v40, %v531_v41 }
 0x463   : > { %v533_v43 = vmul.f32 0.5, %v532_v42 }
 0x465   : > { %v534_v45 = vsub.f32 1.5, %v533_v43 }
 0x467   : > { %v535_v46 = vmul.f32 %v952_v40, %v534_v45 }
 0x469   : > { %v536_v47 = vmul.f32 %v535_v46, %v529_v39 }
 0x46b   : > { %v538_v49 = vsel %vm537_vm15, %v529_v39, %v536_v47 }
 0x46c   : > { %v541_v50 = vsel %vm539_vm0, %v540_v48, %v538_v49 }
 0x46d   : > { %v543_v52 = vmul.f32 0.47942555, %v541_v50 }
 0x46f   : > { %v544_v55 = vsub.f32 %v542_v51, %v543_v52 }
 0x471   : > { %v546_v57 = vsel %vm526_vm1, %v544_v55, %v871_v56 }
 0x472   : > { %v547_v58 = vsel %vm518_vm5, %v546_v57, %v1181_v44 }
 0x473   : > { %v548_v59 = vmul.f32 64.0, %v547_v58 }
 0x475   : > { %549 = vst [vmem:[%s1160_s8] sm:$0xff] %v548_v59 }
 0x476   : > { %980 = shalt.err (!%p977_p10)
}
 0x477   : > { %890 = dma.vmem_to_hbm [thread:$0]  (%p1105_p5), %s654_s12, 128, %s656_s13, %s627_s15   ;;  %v612_v53 = vcvt.s32.f32 %v610_v60  ;;  %vm624_vm3 = vcmask 31768  }
 0x4c7   : > { %v615_v44 = vpop.xlane.xlu2 %614 }
 0x4c8   : > { %vm616_vm2 = vcmp.eq.f32.partialorder %v613_v37, %v615_v44  ;;  %v621_v61 = vcvt.f32.s32 %v615_v44 }
 0x4c9   : > { %v617_v54 = vsel %vm616_vm2, %v612_v53, -inf }
 0x4ca   : > { %618 = vmax.xlane.f32.xlu2 %v617_v54  ;;  %v622_v63 = vshll.u32 %v621_v61, 16 }
 0x53d   : > { %v619_v62 = vpop.xlane.xlu2 %618 }
 0x53e   : > { %v620_v0 = vcvt.f32.s32 %v619_v62 }
 0x540   : > { %v623_v1 = vadd.s32 %v622_v63, %v620_v0 }
 0x542   : > { %625 = vst.msk [vmem:[%s1156_s29] sm:$0xff] %vm624_vm3, %v623_v1 }
 0x543 PF: > { %p896_p11 = scmp.ge.s32.totalorder %s1031_s23, 2  ;;  %s680_s28 = sand.u32 1, %s1011_s18  }
 0x544   : > { %s681_s14 = scalar_lea.sflag [#allocation5], %s680_s28 }
 0x545   : > { %p893_p5 = pnand %p896_p11, %p1116_p9 }
 0x547   : > { %p894_p12 = pneg %p893_p5 }
 0x549   : > { %1006 = dma.done.wait (%p894_p12), %s681_s14, 128  }
 0x54a   : > { %1008 = vsyncadd (%p894_p12), %s681_s14, 4294967168  ;;  %s19_s23 = sadd.s32 1, %s1031_s23   ;;  %s1262_s18 = smov %s1015_s19 }
 0x54b   : > { %p16_p13 = scmp.ge.s32.totalorder %s19_s23, 5   ;;  %s1263_s19 = smov %s1019_s20 }
 0x54c   : > { %s1264_s20 = smov %s1114_s30  ;;  %s1265_s21 = smov %s1027_s22 }
 0x54d   : > { %s1266_s22 = smov %s1268_s26  ;;  %18 = sbr.rel (!%p16_p13) target bundleno = 4 (0x4), region = 147 }
 0x552   :  { %698 = vsyncpa [#allocation5], 1 }
 0x553   :  { %700 = vsyncpa [#allocation5 + $0x1], 1 }

</bundles_post_ra>
